<compile_context>
chip_gen: v7x
topology: tpu7x:2x2x1
jax: 0.10.0
libtpu: 0.0.40
codegen_flags: <defaults>
</compile_context>

<pallas_src>
import functools
import math

import jax
import jax.numpy as jnp
from jax import lax
from jax.experimental import pallas as pl
from jax.experimental.pallas import tpu as pltpu


def _adain_kernel(gamma_ref, beta_ref, x_ref, o_ref, *, eps):
    """One (batch-tile, channel-tile) block per grid step.

    gamma_ref : (TB, TC, 1)  f32, precomputed fc output (gamma half)
    beta_ref  : (TB, TC, 1)  f32, precomputed fc output (beta half)
    x_ref     : (TB, TC, HW) native dtype, spatial flattened onto lanes
    o_ref     : (TB, TC, HW) native dtype
    """
    x = x_ref[...].astype(jnp.float32)                              # (TB,TC,HW)

    # Instance-norm statistics: per-(b,c) reduction over the lane (HW) axis.
    mu = jnp.mean(x, axis=-1, keepdims=True)                        # (TB,TC,1)
    var = jnp.mean(jnp.square(x - mu), axis=-1, keepdims=True)      # (TB,TC,1)

    # Fold normalization + AdaIN modulation into one scale/shift.
    scale = (1.0 + gamma_ref[...]) * lax.rsqrt(var + eps)           # (TB,TC,1)
    shift = beta_ref[...] - mu * scale                               # (TB,TC,1)

    o_ref[...] = (x * scale + shift).astype(o_ref.dtype)


def _pick_tiles(B, C, HW, itemsize, target_bytes=2 << 20):
    """Choose (TB, TC): TC divides C and is a multiple of the sublane pack
    (or equals C); block bytes ~<= target so 2-deep pipelining fits VMEM."""
    sub = max(8, 32 // itemsize)            # 8 for f32, 16 for bf16, 32 for int8
    # Channel tile.
    if C * HW * itemsize <= target_bytes:
        tc = C
    else:
        tc = None
        t = sub
        while t <= C:
            if C % t == 0 and t * HW * itemsize <= target_bytes:
                tc = t
            t += sub
        if tc is None:
            tc = C                           # fallback: full C (always legal)
    # Batch tile (only grows while the block stays under target).
    tb = 1
    for t in range(1, B + 1):
        if B % t == 0 and t * tc * HW * itemsize <= target_bytes:
            tb = t
    return tb, tc


def adain_forward(x, s, fc_w, fc_b, *, eps=1e-5):
    """x: (B, C, H, W); s: (B, S); fc_w: (2C, S); fc_b: (2C,) -> (B, C, H, W)."""
    B, C, H, W = x.shape
    HW = H * W

    # Style fc in the wrapper: a few KB of HBM, negligible vs. C*HW traffic.
    h = (s.astype(jnp.float32) @ fc_w.astype(jnp.float32).T
         + fc_b.astype(jnp.float32))                                # (B, 2C)
    gamma = h[:, :C].reshape(B, C, 1)                               # (B, C, 1)
    beta = h[:, C:].reshape(B, C, 1)                                # (B, C, 1)

    x3 = x.reshape(B, C, HW)            # contiguous reshape, no cast: native dtype
    itemsize = jnp.dtype(x.dtype).itemsize
    TB, TC = _pick_tiles(B, C, HW, itemsize)
    grid = (B // TB, C // TC)

    out = pl.pallas_call(
        functools.partial(_adain_kernel, eps=eps),
        out_shape=jax.ShapeDtypeStruct((B, C, HW), x.dtype),
        grid=grid,
        in_specs=[
            pl.BlockSpec((TB, TC, 1), lambda b, c: (b, c, 0)),      # gamma
            pl.BlockSpec((TB, TC, 1), lambda b, c: (b, c, 0)),      # beta
            pl.BlockSpec((TB, TC, HW), lambda b, c: (b, c, 0)),     # x
        ],
        out_specs=pl.BlockSpec((TB, TC, HW), lambda b, c: (b, c, 0)),
        compiler_params=pltpu.CompilerParams(
            dimension_semantics=("parallel", "parallel")),
    )(gamma, beta, x3)
    return out.reshape(B, C, H, W)


def adain_reference(x, s, fc_w, fc_b, eps=1e-5):
    """Pure-JAX reference matching torch AdaIN.forward (eval mode)."""
    B, C, H, W = x.shape
    xf = x.astype(jnp.float32)
    h = s.astype(jnp.float32) @ fc_w.astype(jnp.float32).T + fc_b.astype(jnp.float32)
    gamma = h[:, :C][:, :, None, None]
    beta = h[:, C:][:, :, None, None]
    mu = jnp.mean(xf, axis=(2, 3), keepdims=True)
    var = jnp.mean((xf - mu) ** 2, axis=(2, 3), keepdims=True)
    xn = (xf - mu) / jnp.sqrt(var + eps)
    return (1.0 + gamma) * xn + beta


if __name__ == "__main__":
    B, C, H, W = 2, 4, 16, 16          # num_features = 4
    STYLE_DIM = 64

    key = jax.random.PRNGKey(0)
    kx, ks, kw, kb = jax.random.split(key, 4)
    x = jax.random.normal(kx, (B, C, H, W), jnp.float32)
    s = jax.random.normal(ks, (B, STYLE_DIM), jnp.float32)
    bound = 1.0 / math.sqrt(STYLE_DIM)   # torch Linear default init range
    fc_w = jax.random.uniform(kw, (2 * C, STYLE_DIM), jnp.float32, -bound, bound)
    fc_b = jax.random.uniform(kb, (2 * C,), jnp.float32, -bound, bound)

    # float32 path: bit-for-bit semantics check against the reference.
    out = jax.block_until_ready(adain_forward(x, s, fc_w, fc_b))
    ref = adain_reference(x, s, fc_w, fc_b)
    assert out.shape == (B, C, H, W), out.shape
    assert out.dtype == x.dtype, out.dtype
    assert bool(jnp.all(jnp.isfinite(out)))
    assert bool(jnp.allclose(out, ref, atol=1e-4, rtol=1e-4)), \
        float(jnp.max(jnp.abs(out - ref)))

    # bf16 path: native-dtype I/O (no wrapper upcast), f32 math inside kernel.
    out_bf16 = jax.block_until_ready(
        adain_forward(x.astype(jnp.bfloat16), s, fc_w, fc_b))
    assert out_bf16.dtype == jnp.bfloat16, out_bf16.dtype
    assert bool(jnp.all(jnp.isfinite(out_bf16.astype(jnp.float32))))
    assert bool(jnp.allclose(out_bf16.astype(jnp.float32),
                             adain_reference(x.astype(jnp.bfloat16), s, fc_w, fc_b),
                             atol=1e-1, rtol=1e-1))

    print("KERNEL_OK")
</pallas_src>

<mosaic_0001>
module attributes {stable_mosaic.version = 11 : i64} {
  func.func @_adain_kernel(%arg0: i32, %arg1: i32, %arg2: memref<2x4x1xf32, #tpu.memory_space<vmem>>, %arg3: memref<2x4x1xf32, #tpu.memory_space<vmem>>, %arg4: memref<2x4x256xf32, #tpu.memory_space<vmem>>, %arg5: memref<2x4x256xf32, #tpu.memory_space<vmem>>) attributes {dimension_semantics = [#tpu.dimension_semantics<parallel>, #tpu.dimension_semantics<parallel>], iteration_bounds = array<i64: 1, 1>, scalar_prefetch = 0 : i64, scratch_operands = 0 : i64, tpu.core_type = #tpu.core_type<tc>, window_params = [{transform_indices = @transform_0, window_bounds = array<i64: 2, 4, 1>}, {transform_indices = @transform_1, window_bounds = array<i64: 2, 4, 1>}, {transform_indices = @transform_2, window_bounds = array<i64: 2, 4, 256>}, {transform_indices = @transform_3, window_bounds = array<i64: 2, 4, 256>}]} {
    %c0 = arith.constant 0 : index
    %c0_0 = arith.constant 0 : index
    %c0_1 = arith.constant 0 : index
    %0 = vector.load %arg4[%c0, %c0_0, %c0_1] : memref<2x4x256xf32, #tpu.memory_space<vmem>>, vector<2x4x256xf32>
    %cst = arith.constant dense<0.000000e+00> : vector<2x4xf32>
    %1 = vector.multi_reduction <add>, %0, %cst [2] : vector<2x4x256xf32> to vector<2x4xf32>
    %2 = vector.shape_cast %1 : vector<2x4xf32> to vector<2x4x1xf32>
    %cst_2 = arith.constant 2.560000e+02 : f32
    %3 = vector.broadcast %cst_2 : f32 to vector<2x4x1xf32>
    %4 = arith.divf %2, %3 : vector<2x4x1xf32>
    %5 = vector.broadcast %4 : vector<2x4x1xf32> to vector<2x4x256xf32>
    %6 = arith.subf %0, %5 : vector<2x4x256xf32>
    %7 = arith.mulf %6, %6 : vector<2x4x256xf32>
    %cst_3 = arith.constant dense<0.000000e+00> : vector<2x4xf32>
    %8 = vector.multi_reduction <add>, %7, %cst_3 [2] : vector<2x4x256xf32> to vector<2x4xf32>
    %9 = vector.shape_cast %8 : vector<2x4xf32> to vector<2x4x1xf32>
    %cst_4 = arith.constant 2.560000e+02 : f32
    %10 = vector.broadcast %cst_4 : f32 to vector<2x4x1xf32>
    %11 = arith.divf %9, %10 : vector<2x4x1xf32>
    %c0_5 = arith.constant 0 : index
    %c0_6 = arith.constant 0 : index
    %c0_7 = arith.constant 0 : index
    %12 = vector.load %arg2[%c0_5, %c0_6, %c0_7] : memref<2x4x1xf32, #tpu.memory_space<vmem>>, vector<2x4x1xf32>
    %cst_8 = arith.constant 1.000000e+00 : f32
    %13 = vector.broadcast %cst_8 : f32 to vector<2x4x1xf32>
    %14 = arith.addf %13, %12 : vector<2x4x1xf32>
    %cst_9 = arith.constant 9.99999974E-6 : f32
    %15 = vector.broadcast %cst_9 : f32 to vector<2x4x1xf32>
    %16 = arith.addf %11, %15 : vector<2x4x1xf32>
    %17 = math.rsqrt %16 : vector<2x4x1xf32>
    %18 = arith.mulf %14, %17 : vector<2x4x1xf32>
    %c0_10 = arith.constant 0 : index
    %c0_11 = arith.constant 0 : index
    %c0_12 = arith.constant 0 : index
    %19 = vector.load %arg3[%c0_10, %c0_11, %c0_12] : memref<2x4x1xf32, #tpu.memory_space<vmem>>, vector<2x4x1xf32>
    %20 = arith.mulf %4, %18 : vector<2x4x1xf32>
    %21 = arith.subf %19, %20 : vector<2x4x1xf32>
    %22 = vector.broadcast %18 : vector<2x4x1xf32> to vector<2x4x256xf32>
    %23 = arith.mulf %0, %22 : vector<2x4x256xf32>
    %24 = vector.broadcast %21 : vector<2x4x1xf32> to vector<2x4x256xf32>
    %25 = arith.addf %23, %24 : vector<2x4x256xf32>
    %c0_13 = arith.constant 0 : index
    %c0_14 = arith.constant 0 : index
    %c0_15 = arith.constant 0 : index
    %26 = vector.load %arg5[%c0_13, %c0_14, %c0_15] : memref<2x4x256xf32, #tpu.memory_space<vmem>>, vector<2x4x256xf32>
    tpu.vector_store %arg5[%c0_13, %c0_14, %c0_15], %25 {strides = array<i32>} : memref<2x4x256xf32, #tpu.memory_space<vmem>>, vector<2x4x256xf32>,
    return
  }
  func.func @transform_0(%arg0: i32, %arg1: i32) -> (i32, i32, i32) {
    %c0_i32 = arith.constant 0 : i32
    %c0_i32_0 = arith.constant 0 : i32
    return %arg0, %arg1, %c0_i32 : i32, i32, i32
  }
  func.func @transform_1(%arg0: i32, %arg1: i32) -> (i32, i32, i32) {
    %c0_i32 = arith.constant 0 : i32
    %c0_i32_0 = arith.constant 0 : i32
    return %arg0, %arg1, %c0_i32 : i32, i32, i32
  }
  func.func @transform_2(%arg0: i32, %arg1: i32) -> (i32, i32, i32) {
    %c0_i32 = arith.constant 0 : i32
    %c0_i32_0 = arith.constant 0 : i32
    return %arg0, %arg1, %c0_i32 : i32, i32, i32
  }
  func.func @transform_3(%arg0: i32, %arg1: i32) -> (i32, i32, i32) {
    %c0_i32 = arith.constant 0 : i32
    %c0_i32_0 = arith.constant 0 : i32
    return %arg0, %arg1, %c0_i32 : i32, i32, i32
  }
}

</mosaic_0001>

<bundles_post_ra>
// kernel: tpu_custom_call.1
= control target key start
LH: loop header
LB: loop body
LE: loop exit
PB: predicated region body
PF: predicated region fallthrough
CT: control target
= control target key end

     0   :  { %vm23_vm0 = vcmask 1043456   ;;  %s285_s0 = inlined_call_operand.vmem [shape: f32[2,4,1], index: 0, kind: input, shape index: {}]   ;;  %s286_s1 = inlined_call_operand.vmem [shape: f32[2,4,1], index: 1, kind: input, shape index: {}]   ;;  %s287_s2 = inlined_call_operand.vmem [shape: f32[2,4,256], index: 2, kind: input, shape index: {}]   ;;  %s288_s3 = inlined_call_operand.hbm [shape: f32[2,4,256], index: 3, kind: output, shape index: {}]  }
   0x1   :  { %v228_v0 = vld [vmem:[%s287_s2] sm:$0xff]  ;;  %v233_v1 = vld [vmem:[%s287_s2 + $0x8] sm:$0xff] }
   0x2   :  { %v19_v2 = vcombine.high %v228_v0, %v228_v0  ;;  %v24_v3 = vsel %vm23_vm0, %v228_v0, 0.0  ;;  %v20_v4 = vcombine.high %v233_v1, %v233_v1 }
   0x3   :  { %8 = vsyncpa [#allocation3], 0  ;;  %v29_v6 = vsel %vm23_vm0, %v233_v1, 0.0  ;;  %v200_v10 = vmov 839922192   ;;  %v42_v12 = vlaneseq  ;;  %v201_v34 = vmov 0  }
   0x4   :  { %v25_v5 = vsel %vm23_vm0, %v19_v2, 0.0  ;;  %v30_v7 = vsel %vm23_vm0, %v20_v4, 0.0  ;;  %v40_v11 = vunpack.c.l.s4 %v200_v10  ;;  %168 = vset.pattern.permute.xlu0 %v201_v34  ;;  %169 = vset.pattern.permute.xlu1 %v201_v34  ;;  %v77_v41 = vld [vmem:[%s285_s0] sm:$0xf]  ;;  %v78_v43 = vld [vmem:[%s285_s0 + $0x4] sm:$0xf] }
   0x5   :  { %v26_v8 = vadd.f32 %v25_v5, %v24_v3  ;;  %v31_v9 = vadd.f32 %v30_v7, %v29_v6  ;;  %v43_v14 = vshrl.u32 %v42_v12, 7  ;;  %v79_v42 = vadd.f32 1.0, %v77_v41  ;;  %v87_v50 = vld [vmem:[%s286_s1] sm:$0xf]  ;;  %v88_v53 = vld [vmem:[%s286_s1 + $0x4] sm:$0xf] }
   0x6   :  { %v41_v13 = vunpack.c.0.s8 %v40_v11  ;;  %v80_v46 = vadd.f32 1.0, %v78_v43  ;;  %s202_s0 = smov [#allocation2]  }
   0x7   :  { %27 = vadd.xlane.f32.xlu0 %v26_v8  ;;  %s152_s23 = sshll.u32 %s202_s0, 4  ;;  %s153_s23 = int_to_ptr.vmem [resolvable:$true] %s152_s23 }
   0x8   :  { %v245_v15 = vsub.s32 %v41_v13, %v43_v14  ;;  %s176_s1 = scalar_lea.vmem %s153_s23, 256  ;;  %p181_p1 = scmp.lt.s32.totalorder %s153_s23, %s153_s23 }
   0x9   :  { %p177_p0 = scmp.ne.s32.totalorder %s153_s23, %s176_s1  ;;  %p182_p2 = scmp.lt.s32.totalorder %s176_s1, %s176_s1 }
   0xb   :  { %32 = vadd.xlane.f32.xlu0 %v31_v9  ;;  %p183_p3 = por %p182_p2, %p181_p1 }
   0xd   :  { %p184_p4 = pnand %p183_p3, %p177_p0 }
  0x94   :  { %v28_v16 = vpop.xlane.xlu0 %27 }
  0x95   :  { %v35_v17 = vmul.f32 0.00390625, %v28_v16 }
  0x97   :  { %v45_v18 = vrot.slane %v35_v17, %v245_v15 }
  0x98   :  { %v33_v19 = vpop.xlane.xlu0 %32 }
  0x99   :  { %v36_v20 = vmul.f32 0.00390625, %v33_v19  ;;  %v55_v21 = vsub.f32 %v228_v0, %v45_v18 }
  0x9b   :  { %v52_v22 = vrot.slane %v36_v20, %v245_v15  ;;  %v57_v23 = vmul.f32 %v55_v21, %v55_v21 }
  0x9d   :  { %v56_v24 = vsub.f32 %v233_v1, %v52_v22  ;;  %v61_v25 = vcombine.high %v57_v23, %v57_v23  ;;  %v65_v26 = vsel %vm23_vm0, %v57_v23, 0.0 }
  0x9f   :  { %v66_v27 = vsel %vm23_vm0, %v61_v25, 0.0  ;;  %v58_v28 = vmul.f32 %v56_v24, %v56_v24 }
  0xa0   :  { %v67_v29 = vadd.f32 %v66_v27, %v65_v26 }
  0xa1   :  { %v62_v30 = vcombine.high %v58_v28, %v58_v28  ;;  %v70_v31 = vsel %vm23_vm0, %v58_v28, 0.0 }
  0xa2   :  { %68 = vadd.xlane.f32.xlu1 %v67_v29 }
  0xa3   :  { %v71_v32 = vsel %vm23_vm0, %v62_v30, 0.0 }
  0xa4   :  { %v72_v33 = vadd.f32 %v71_v32, %v70_v31 }
  0xa6   :  { %73 = vadd.xlane.f32.xlu1 %v72_v33 }
 0x12f   :  { %v69_v35 = vpop.xlane.xlu1 %68 }
 0x130   :  { %v75_v36 = vmul.f32 0.00390625, %v69_v35 }
 0x132   :  { %v81_v37 = vadd.f32 1e-05, %v75_v36 }
 0x133   :  { %v74_v38 = vpop.xlane.xlu1 %73 }
 0x134   :  { %172 = vrsqrt.f32 %v81_v37  ;;  %v76_v39 = vmul.f32 0.00390625, %v74_v38 }
 0x136   :  { %v82_v40 = vadd.f32 1e-05, %v76_v39 }
 0x138   :  { %174 = vrsqrt.f32 %v82_v40 }
 0x13e   :  { %v173_v44 = vpop.eup %172 }
 0x13f   :  { %v85_v45 = vmul.f32 %v173_v44, %v79_v42 }
 0x141   :  { %95 = vperm.xlu0 %168, %v85_v45   ;;  %v89_v49 = vmul.f32 %v85_v45, %v35_v17 }
 0x142   :  { %v175_v47 = vpop.eup %174 }
 0x143   :  { %v86_v48 = vmul.f32 %v175_v47, %v80_v46  ;;  %v91_v51 = vsub.f32 %v87_v50, %v89_v49 }
 0x145   :  { %99 = vperm.xlu1 %169, %v86_v48   ;;  %v90_v52 = vmul.f32 %v86_v48, %v36_v20 }
 0x147   :  { %v92_v54 = vsub.f32 %v88_v53, %v90_v52 }
 0x149   :  { %121 = vperm.xlu1 %169, %v91_v51  }
 0x14d   :  { %125 = vperm.xlu1 %169, %v92_v54  }
 0x1c0   :  { %v96_v55 = vpop.permute.xlu0 %95 }
 0x1c1   :  { %v107_v57 = vrot.slane %v96_v55, %v245_v15 }
 0x1c3   :  { %v117_v59 = vmul.f32 %v107_v57, %v228_v0 }
 0x1c4   :  { %v100_v56 = vpop.permute.xlu1 %99 }
 0x1c5   :  { %v114_v60 = vrot.slane %v100_v56, %v245_v15 }
 0x1c7   :  { %v118_v2 = vmul.f32 %v114_v60, %v233_v1 }
 0x1c8   :  { %v122_v58 = vpop.permute.xlu1 %121 }
 0x1c9   :  { %v133_v61 = vrot.slane %v122_v58, %v245_v15 }
 0x1cb   :  { %v143_v62 = vadd.f32 %v133_v61, %v117_v59 }
 0x1cc   :  { %v126_v63 = vpop.permute.xlu1 %125 }
 0x1cd   :  { %145 = vst [vmem:[#allocation2] sm:$0xff] %v143_v62  ;;  %v140_v3 = vrot.slane %v126_v63, %v245_v15 }
 0x1cf   :  { %v144_v4 = vadd.f32 %v140_v3, %v118_v2 }
 0x1d1   :  { %146 = vst [vmem:[#allocation2 + $0x8] sm:$0xff] %v144_v4 }
 0x1d2   :  { %187 = shalt.err (!%p184_p4)
}
 0x1d3   :  { %s188_s26 = scalar_lea.hbm %s288_s3, 256 }
 0x1d4   :  { %p189_p5 = scmp.ne.s32.totalorder %s288_s3, %s188_s26  ;;  %p192_p6 = scmp.lt.u32.totalorder %s188_s26, %s288_s3 }
 0x1d6   :  { %p194_p7 = pnand %p192_p6, %p189_p5 }
 0x1d8   :  { %197 = shalt.err (!%p194_p7)
}
 0x1d9   :  { %s203_s4 = smov 128   ;;  %s204_s5 = smov 8  }
 0x1da   :  { %158 = dma.vmem_to_hbm [thread:$0]  %s153_s23, 256, %s288_s3, [#allocation3], %s203_s4, %s203_s4, %s204_s5  }
 0x1db   :  { %198 = dma.done.wait [#allocation3], 256  }
 0x1dc   :  { %199 = vsyncadd [#allocation3], 4294967040 }
 0x1dd   :  { %162 = vsyncpa [#allocation3], 1 }

</bundles_post_ra>
